<compile_context>
chip_gen: v6e
topology: v6e:2x2x1
jax: 0.10.0
libtpu: 0.0.40
codegen_flags: <defaults>
</compile_context>

<pallas_src>
import functools

import numpy as np
import jax
import jax.numpy as jnp
from jax.experimental import pallas as pl
from jax.experimental.pallas import tpu as pltpu


# ------------------------------- kernel ------------------------------------ #

def _recover_kernel(x_ref, o_ref, *, pf, nBt):
    """f_first=False patch recovery (one grid step = Gf frequency blocks).

    x_ref: (1, Gf, nBt*pf, L)   input rows ordered (bt, fi),  L = pt*C
    o_ref: (1, Gf, pf*nBt, L)   output rows ordered (fi, bt)

    For each within-patch frequency row fi, gather its nBt time-blocks with a
    sublane-strided load (stride pf) and write them as one contiguous,
    lane-dense store.  The strided/relayout cost sits on the load side (3 vld
    slots) while the single store slot stays dense.
    """
    if pf == 1 or nBt == 1:
        # (bt, fi) and (fi, bt) row orderings coincide -> plain dense copy.
        o_ref[...] = x_ref[...]
        return
    for fi in range(pf):                      # pf is small & static -> unrolled
        o_ref[:, :, pl.ds(fi * nBt, nBt), :] = (
            x_ref[:, :, pl.ds(fi, nBt, stride=pf), :])


# --------------------------- VMEM / grouping -------------------------------- #

def _round_up(x, m):
    return ((x + m - 1) // m) * m


def _padded_tile_bytes(sublanes, lanes, itemsize):
    """VMEM bytes of a (..., sublanes, lanes) slab after (8, 128) tile padding."""
    return _round_up(sublanes, 8) * _round_up(lanes, 128) * itemsize


def _vmem_budget():
    """(physical VMEM bytes, slab budget bytes) for the current TPU generation."""
    try:
        cap = int(pltpu.get_tpu_info().vmem_capacity_bytes)
    except Exception:                # conservative fallback: assume v7x-sized VMEM
        cap = 64 * 1024 * 1024
    # ~45% of physical VMEM for the (double-buffered, in+out) slab:
    #   v7x 64 MiB -> ~28 MiB,   v5e/v6e 128 MiB -> ~57 MiB.
    return cap, max(8 * 1024 * 1024, int(cap * 0.45))


def _pick_group(n_blocks, per_block_bytes, other_parallel, budget_bytes,
                min_total_steps=8):
    """Largest divisor Gf of n_blocks whose padded, double-buffered in+out slab
    fits budget_bytes while keeping >= min_total_steps (preferably even) grid
    steps, so the DMA pipeline and both v7x TensorCores stay busy."""
    divisors = [d for d in range(1, n_blocks + 1) if n_blocks % d == 0]
    fitting = [d for d in divisors if d * per_block_bytes <= budget_bytes] or [1]

    def steps(g):
        return other_parallel * (n_blocks // g)

    for ok in (lambda g: steps(g) >= min_total_steps and steps(g) % 2 == 0,
               lambda g: steps(g) >= min_total_steps,
               lambda g: True):
        cand = [d for d in fitting if ok(d)]
        if cand:
            return max(cand)
    return 1


# ------------------------------- module ------------------------------------- #

class PatchRecover:
    """JAX / Pallas-TPU port of the PyTorch PatchRecover module."""

    def __init__(self, output_shape, patch_shape, f_first=False):
        self.output_shape = tuple(int(v) for v in output_shape)
        self.patch_shape = tuple(int(v) for v in patch_shape)
        self.f_first = bool(f_first)

    def __call__(self, data):
        return self.forward(data)

    def forward(self, data):
        data = jnp.asarray(data)
        nf, nt = self.output_shape
        pf, pt = self.patch_shape
        assert nf % pf == 0 and nt % pt == 0, "output_shape must tile by patch_shape"
        nBf, nBt = nf // pf, nt // pt

        if data.ndim == 4:
            nb, npatch, pe, nmic = data.shape
            trailing = (nmic,)
        elif data.ndim == 5:
            nb, npatch, pe, nreim, nmic = data.shape
            trailing = (nreim, nmic)
        else:
            raise ValueError("data must be 4-D or 5-D")
        assert pe == pf * pt and npatch == nBf * nBt

        C = 1
        for v in trailing:
            C *= int(v)

        if self.f_first:
            # Lane dim would only be C (mics) -> lane-sparse; a single fused XLA
            # transpose is closer to the HBM roofline than a C-wide-lane Pallas
            # copy (perf review, option b).
            # TODO(synk): a lane-dense Pallas f_first kernel needs an in-kernel
            # (pt, pf) lane/sublane relayout (XLU einshape/roll); not done here.
            d = data.reshape(nb, nBt, nBf, pt, pf, C)
            y = jnp.transpose(d, (0, 2, 4, 1, 3, 5))    # (nb, nBf, pf, nBt, pt, C)
            return y.reshape(nb, nf, nt, *trailing)

        # ------------------ f_first = False : Pallas kernel ------------------ #
        L = pt * C                                       # lane-dense row width
        x = data.reshape(nb, nBf, nBt * pf, L)           # contiguous (zero-copy)
        itemsize = jnp.dtype(data.dtype).itemsize

        # Padding-aware bytes per unit of the grouped frequency-block axis:
        # (input + output) slabs, each double-buffered by the Pallas pipeline.
        per_bf_bytes = 2 * (_padded_tile_bytes(nBt * pf, L, itemsize)
                            + _padded_tile_bytes(pf * nBt, L, itemsize))
        vmem_cap, budget = _vmem_budget()
        Gf = _pick_group(nBf, per_bf_bytes, other_parallel=nb, budget_bytes=budget)
        slab_bytes = Gf * per_bf_bytes
        vmem_limit = int(min(vmem_cap,
                             max(32 * 1024 * 1024, slab_bytes + 16 * 1024 * 1024)))

        grid = (nb, nBf // Gf)
        kernel = functools.partial(_recover_kernel, pf=pf, nBt=nBt)
        y = pl.pallas_call(
            kernel,
            out_shape=jax.ShapeDtypeStruct((nb, nBf, pf * nBt, L), data.dtype),
            grid_spec=pltpu.PrefetchScalarGridSpec(
                num_scalar_prefetch=0,
                grid=grid,
                in_specs=[pl.BlockSpec((1, Gf, nBt * pf, L),
                                       lambda b, g: (b, g, 0, 0))],
                out_specs=pl.BlockSpec((1, Gf, pf * nBt, L),
                                       lambda b, g: (b, g, 0, 0)),
            ),
            compiler_params=pltpu.CompilerParams(
                dimension_semantics=("parallel", "parallel"),
                vmem_limit_bytes=vmem_limit),
        )(x)

        # Free contiguous reshape to the PyTorch output layout.
        return y.reshape(nb, nf, nt, *trailing)


# --------------------------- pure-JAX reference ----------------------------- #

def _ref_patch_recover(data, output_shape, patch_shape, f_first):
    """Mirrors torch F.fold (stride == kernel_size) + the module's permutes."""
    nf, nt = output_shape
    pf, pt = patch_shape
    nBf, nBt = nf // pf, nt // pt
    if data.ndim == 4:
        nb, npatch, pe, nmic = data.shape
        trailing = (nmic,)
    else:
        nb, npatch, pe, nreim, nmic = data.shape
        trailing = (nreim, nmic)
    C = 1
    for v in trailing:
        C *= int(v)
    d = data.reshape(nb, npatch, pe, C)
    if f_first:
        d = d.reshape(nb, nBt, nBf, pt, pf, C)
        y = jnp.transpose(d, (0, 2, 4, 1, 3, 5))   # (nb, nBf, pf, nBt, pt, C)
    else:
        d = d.reshape(nb, nBf, nBt, pf, pt, C)
        y = jnp.transpose(d, (0, 1, 3, 2, 4, 5))   # (nb, nBf, pf, nBt, pt, C)
    return y.reshape(nb, nf, nt, *trailing)


# --------------------------------- demo ------------------------------------- #

if __name__ == "__main__":
    key = jax.random.PRNGKey(0)
    nb, nmic, nreim = 2, 4, 2
    nf, nt = 16, 32
    pf, pt = 4, 8
    nBf, nBt = nf // pf, nt // pt
    npatch, pe = nBf * nBt, pf * pt

    k1, k2, k3 = jax.random.split(key, 3)
    x4 = jax.random.normal(k1, (nb, npatch, pe, nmic), dtype=jnp.float32)
    x5 = jax.random.normal(k2, (nb, npatch, pe, nreim, nmic), dtype=jnp.float32)
    x4f = jax.random.normal(k3, (nb, npatch, pe, nmic), dtype=jnp.float32)

    mod = PatchRecover((nf, nt), (pf, pt), f_first=False)
    mod_f = PatchRecover((nf, nt), (pf, pt), f_first=True)

    y4 = jax.block_until_ready(mod(x4))       # 4-D input,  f_first=False (Pallas)
    y5 = jax.block_until_ready(mod(x5))       # 5-D input,  f_first=False (Pallas)
    y4f = jax.block_until_ready(mod_f(x4f))   # 4-D input,  f_first=True  (XLA transpose)

    assert y4.shape == (nb, nf, nt, nmic)
    assert y5.shape == (nb, nf, nt, nreim, nmic)
    assert y4f.shape == (nb, nf, nt, nmic)

    np.testing.assert_array_equal(
        np.asarray(y4), np.asarray(_ref_patch_recover(x4, (nf, nt), (pf, pt), False)))
    np.testing.assert_array_equal(
        np.asarray(y5), np.asarray(_ref_patch_recover(x5, (nf, nt), (pf, pt), False)))
    np.testing.assert_array_equal(
        np.asarray(y4f), np.asarray(_ref_patch_recover(x4f, (nf, nt), (pf, pt), True)))

    print("KERNEL_OK")
</pallas_src>

<mosaic_0001>
module attributes {stable_mosaic.version = 11 : i64} {
  func.func @_recover_kernel(%arg0: i32, %arg1: i32, %arg2: memref<1x1x16x32xf32, #tpu.memory_space<vmem>>, %arg3: memref<1x1x16x32xf32, #tpu.memory_space<vmem>>) attributes {dimension_semantics = [#tpu.dimension_semantics<parallel>, #tpu.dimension_semantics<parallel>], iteration_bounds = array<i64: 2, 4>, scalar_prefetch = 0 : i64, scratch_operands = 0 : i64, tpu.core_type = #tpu.core_type<tc>, window_params = [{transform_indices = @transform_0, window_bounds = array<i64: 1, 1, 16, 32>}, {transform_indices = @transform_1, window_bounds = array<i64: 1, 1, 16, 32>}]} {
    %c0 = arith.constant 0 : index
    %c0_0 = arith.constant 0 : index
    %c0_1 = arith.constant 0 : index
    %c0_2 = arith.constant 0 : index
    %0 = tpu.strided_load %arg2[%c0, %c0_0, %c0_1, %c0_2] {strides = array<i32: 1, 1, 4, 1>} : memref<1x1x16x32xf32, #tpu.memory_space<vmem>>, vector<1x1x4x32xf32>
    %c0_3 = arith.constant 0 : index
    %c0_4 = arith.constant 0 : index
    %c0_5 = arith.constant 0 : index
    %c0_6 = arith.constant 0 : index
    %1 = vector.load %arg3[%c0_3, %c0_4, %c0_5, %c0_6] : memref<1x1x16x32xf32, #tpu.memory_space<vmem>>, vector<1x1x4x32xf32>
    tpu.vector_store %arg3[%c0_3, %c0_4, %c0_5, %c0_6], %0 {strides = array<i32>} : memref<1x1x16x32xf32, #tpu.memory_space<vmem>>, vector<1x1x4x32xf32>,
    %c0_7 = arith.constant 0 : index
    %c0_8 = arith.constant 0 : index
    %c1 = arith.constant 1 : index
    %c0_9 = arith.constant 0 : index
    %2 = tpu.strided_load %arg2[%c0_7, %c0_8, %c1, %c0_9] {strides = array<i32: 1, 1, 4, 1>} : memref<1x1x16x32xf32, #tpu.memory_space<vmem>>, vector<1x1x4x32xf32>
    %c0_10 = arith.constant 0 : index
    %c0_11 = arith.constant 0 : index
    %c4 = arith.constant 4 : index
    %c0_12 = arith.constant 0 : index
    %3 = vector.load %arg3[%c0_10, %c0_11, %c4, %c0_12] : memref<1x1x16x32xf32, #tpu.memory_space<vmem>>, vector<1x1x4x32xf32>
    tpu.vector_store %arg3[%c0_10, %c0_11, %c4, %c0_12], %2 {strides = array<i32>} : memref<1x1x16x32xf32, #tpu.memory_space<vmem>>, vector<1x1x4x32xf32>,
    %c0_13 = arith.constant 0 : index
    %c0_14 = arith.constant 0 : index
    %c2 = arith.constant 2 : index
    %c0_15 = arith.constant 0 : index
    %4 = tpu.strided_load %arg2[%c0_13, %c0_14, %c2, %c0_15] {strides = array<i32: 1, 1, 4, 1>} : memref<1x1x16x32xf32, #tpu.memory_space<vmem>>, vector<1x1x4x32xf32>
    %c0_16 = arith.constant 0 : index
    %c0_17 = arith.constant 0 : index
    %c8 = arith.constant 8 : index
    %c0_18 = arith.constant 0 : index
    %5 = vector.load %arg3[%c0_16, %c0_17, %c8, %c0_18] : memref<1x1x16x32xf32, #tpu.memory_space<vmem>>, vector<1x1x4x32xf32>
    tpu.vector_store %arg3[%c0_16, %c0_17, %c8, %c0_18], %4 {strides = array<i32>} : memref<1x1x16x32xf32, #tpu.memory_space<vmem>>, vector<1x1x4x32xf32>,
    %c0_19 = arith.constant 0 : index
    %c0_20 = arith.constant 0 : index
    %c3 = arith.constant 3 : index
    %c0_21 = arith.constant 0 : index
    %6 = tpu.strided_load %arg2[%c0_19, %c0_20, %c3, %c0_21] {strides = array<i32: 1, 1, 4, 1>} : memref<1x1x16x32xf32, #tpu.memory_space<vmem>>, vector<1x1x4x32xf32>
    %c0_22 = arith.constant 0 : index
    %c0_23 = arith.constant 0 : index
    %c12 = arith.constant 12 : index
    %c0_24 = arith.constant 0 : index
    %7 = vector.load %arg3[%c0_22, %c0_23, %c12, %c0_24] : memref<1x1x16x32xf32, #tpu.memory_space<vmem>>, vector<1x1x4x32xf32>
    tpu.vector_store %arg3[%c0_22, %c0_23, %c12, %c0_24], %6 {strides = array<i32>} : memref<1x1x16x32xf32, #tpu.memory_space<vmem>>, vector<1x1x4x32xf32>,
    return
  }
  func.func @transform_0(%arg0: i32, %arg1: i32) -> (i32, i32, i32, i32) {
    %c0_i32 = arith.constant 0 : i32
    %c0_i32_0 = arith.constant 0 : i32
    %c0_i32_1 = arith.constant 0 : i32
    return %arg0, %arg1, %c0_i32, %c0_i32_0 : i32, i32, i32, i32
  }
  func.func @transform_1(%arg0: i32, %arg1: i32) -> (i32, i32, i32, i32) {
    %c0_i32 = arith.constant 0 : i32
    %c0_i32_0 = arith.constant 0 : i32
    %c0_i32_1 = arith.constant 0 : i32
    return %arg0, %arg1, %c0_i32, %c0_i32_0 : i32, i32, i32, i32
  }
}

</mosaic_0001>

<bundles_post_ra>
// kernel: tpu_custom_call.1
= control target key start
LH: loop header
LB: loop body
LE: loop exit
PB: predicated region body
PF: predicated region fallthrough
CT: control target
= control target key end

     0   :  { %6 = vsyncpa [#allocation3], 0  ;;  %s681_s0 = inlined_call_operand.hbm [shape: f32[2,4,16,32], index: 0, kind: input, shape index: {}]   ;;  %s682_s1 = inlined_call_operand.hbm [shape: f32[2,4,16,32], index: 1, kind: output, shape index: {}]  }
   0x1   :  { %8 = vsyncpa [#allocation3 + $0x1], 0 }
   0x2   :  { %9 = vsyncpa [#allocation4], 0 }
   0x3   :  { %11 = vsyncpa [#allocation4 + $0x1], 0  ;;  %s515_s6 = smov 0   ;;  %s517_s7 = smov 0  }
   0x4   :  { %s519_s8 = smov 0   ;;  %s521_s9 = smov 0  }
   0x5   :  { %s523_s10 = smov 0   ;;  %s525_s11 = smov 0  }
   0x6   :  { %s527_s12 = smov 0   ;;  %s529_s13 = smov 0  }
   0x7 LB: > { %s271_s14 = sadd.s32 4294967295, %s497_s13   ;;  %s272_s15 = sadd.s32 4294967294, %s497_s13   ;;  %s497_s13 = sphi %s529_s13, %s17_s13   ;;  %s493_s12 = sphi %s527_s12, %s694_s12   ;;  %s489_s11 = sphi %s525_s11, %s693_s11   ;;  %s485_s10 = sphi %s523_s10, %s692_s10   ;;  %s481_s9 = sphi %s521_s9, %s691_s9   ;;  %s477_s8 = sphi %s519_s8, %s690_s8   ;;  %s473_s7 = sphi %s517_s7, %s689_s7   ;;  %s469_s6 = sphi %s515_s6, %s688_s6  }
   0x8   : > { %s26_s16 = sadd.s32 1, %s489_s11  ;;  %s29_s17 = sadd.s32 1, %s493_s12 }
   0x9   : > { %p27_p0 = scmp.ge.s32.totalorder %s26_s16, 4  ;;  %s38_s18 = sadd.s32 1, %s477_s8 }
   0xa   : > { %p45_p1 = scmp.ne.s32.totalorder %s477_s8, %s473_s7  ;;  %p46_p2 = scmp.eq.s32.totalorder %s497_s13, 0 }
   0xb   : > { %s696_s16 = smov (%p27_p0, %s26_s16), 0  ;;  %s698_s17 = smov (!%p27_p0, %s29_s17), %s493_s12 }
   0xc   : > { %s34_s19 = ssub.s32 %s489_s11, %s696_s16  ;;  %p568_p3 = por %p46_p2, %p45_p1 }
   0xd   : > { %p31_p4 = scmp.ge.s32.totalorder %s698_s17, 2  ;;  %p51_p5 = scmp.ne.s32.totalorder %s473_s7, %s469_s6 }
   0xe   : > { %p52_p6 = scmp.eq.s32.totalorder %s271_s14, 0  ;;  %p77_p7 = scmp.eq.s32.totalorder %s271_s14, 7 }
   0xf   : > { %s700_s17 = smov (%p31_p4, %s698_s17), 0  ;;  %p83_p10 = scmp.eq.s32.totalorder %s272_s15, 7 }
  0x10   : > { %p576_p8 = por %p52_p6, %p51_p5  ;;  %p580_p9 = por %p77_p7, %p45_p1 }
  0x11   : > { %s33_s23 = ssub.s32 %s493_s12, %s700_s17  ;;  %p586_p12 = por %p83_p10, %p51_p5 }
  0x12   : > { %s35_s24 = sor.u32 %s34_s19, %s33_s23  ;;  %p303_p13 = scmp.lt.s32.totalorder %s497_s13, 8 }
  0x13   : > { %p36_p11 = scmp.eq.s32.totalorder %s35_s24, 0  ;;  %s103_s26 = sand.u32 1, %s477_s8  }
  0x14   : > { %s275_s28 = sshll.u32 %s103_s26, 4  ;;  %s276_s29 = sshll.u32 %s489_s11, 1 }
  0x15   : > { %s593_s27 = scalar_select %p36_p11, %s477_s8, %s38_s18  }
  0x16   : > { %s277_s30 = sshll.u32 %s493_s12, 3  ;;  %s107_s2 = scalar_lea.vmem [#allocation2], %s275_s28 }
  0x17   : > { %s116_s3 = sshll.u32 %s107_s2, 4  ;;  %s113_s4 = sadd.s32 %s277_s30, %s276_s29  ;;  %s117_s3 = int_to_ptr.vmem [resolvable:$true] %s116_s3 }
  0x18   : > { %s278_s5 = sshll.u32 %s113_s4, 7  ;;  %p599_p0 = pnand %p303_p13, %p568_p3 }
  0x19   : > { %s115_s23 = scalar_lea.hbm %s681_s0, %s278_s5  ;;  %s104_s18 = scalar_lea.sflag [#allocation3], %s103_s26 }
  0x1a   : > { %p375_p1 = pneg %p599_p0  ;;  %s386_s24 = scalar_lea.vmem %s117_s3, 256 }
  0x1b   : > { %p387_p2 = scmp.ne.s32.totalorder %s117_s3, %s386_s24  ;;  %s499_s28 = smov [#allocation2]  }
  0x1c   : > { %s391_s29 = sshll.u32 %s499_s28, 4  ;;  %s392_s29 = int_to_ptr.vmem [resolvable:$false] %s391_s29 }
  0x1d   : > { %p389_p4 = pnand %p387_p2, %p375_p1  ;;  %s393_s20 = scalar_lea.vmem %s392_s29, 512 }
  0x1e   : > { %p394_p3 = scmp.lt.s32.totalorder %s117_s3, %s392_s29  ;;  %p395_p6 = scmp.lt.s32.totalorder %s393_s20, %s386_s24 }
  0x1f   : > { %p390_p5 = pneg %p389_p4 }
  0x20   : > { %p396_p7 = por %p395_p6, %p394_p3 }
  0x22   : > { %p397_p10 = pnand %p396_p7, %p390_p5 }
  0x24   : > { %400 = shalt.err (!%p397_p10)
}
  0x25   : > { %s500_s30 = smov 128   ;;  %s501_s26 = smov 8  }
  0x26   : > { %298 = dma.hbm_to_vmem [thread:$0]  (!%p599_p0), %s115_s23, 256, %s117_s3, %s104_s18, %s500_s30, %s500_s30, %s501_s26  }
  0x27   : > { %p279_p11 = scmp.ge.s32.totalorder %s497_s13, 1  ;;  %p124_p13 = scmp.lt.s32.totalorder %s497_s13, 9 }
  0x29   : > { %p125_p1 = pnand %p279_p11, %p124_p13 }
  0x2a   : > { %s613_s2 = sand.u32 (!%p125_p1), 1, %s473_s7  }
  0x2b   : > { %128 = sbr.rel (%p125_p1) target bundleno = 76 (0x4c), region = 24  ;;  %s280_s4 = sshll.u32 (!%p125_p1), %s613_s2, 4 }
  0x2c   : > { %s131_s5 = scalar_lea.sflag (!%p125_p1), [#allocation3], %s613_s2  ;;  %s134_s15 = scalar_lea.vmem (!%p125_p1), [#allocation2], %s280_s4 }
  0x30   : > { %460 = dma.done.wait (%p576_p8), %s131_s5, 256  }
  0x31   : > { %462 = vsyncadd (%p576_p8), %s131_s5, 4294967040  ;;  %s286_s3 = sshll.u32 %s481_s9, 1  ;;  %s287_s14 = sshll.u32 %s485_s10, 3  ;;  %vm154_vm0 = vcmask 257024  }
  0x32   : > { %s178_s19 = sadd.s32 %s287_s14, %s286_s3  ;;  %s152_s23 = scalar_lea.vmem [#allocation5], %s280_s4  ;;  %v153_v0 = vld [vmem:[%s134_s15] ss:$4 sm:$0xf] }
  0x33   : > { %s181_s18 = sshll.u32 %s152_s23, 4  ;;  %s288_s24 = sshll.u32 %s178_s19, 7  ;;  %v282_v1 = vld [vmem:[%s134_s15 + $0x1] ss:$4 sm:$0xf]  ;;  %s623_s18 = int_to_ptr.vmem [resolvable:$true] %s181_s18 }
  0x34   : > { %s628_s29 = scalar_lea.hbm %s682_s1, %s288_s24  ;;  %155 = vst.msk [vmem:[%s152_s23] sm:$0xf] %vm154_vm0, %v153_v0  ;;  %158 = vst.msk [vmem:[%s152_s23 + $0x4] sm:$0xf] %vm154_vm0, %v282_v1  ;;  %s166_s9 = scalar_lea.sflag [#allocation4], %s613_s2 }
  0x35   : > { %v283_v2 = vld [vmem:[%s134_s15 + $0x2] ss:$4 sm:$0xf]  ;;  %v284_v3 = vld [vmem:[%s134_s15 + $0x3] ss:$4 sm:$0xf] }
  0x36   : > { %161 = vst.msk [vmem:[%s152_s23 + $0x8] sm:$0xf] %vm154_vm0, %v283_v2  ;;  %164 = vst.msk [vmem:[%s152_s23 + $0xc] sm:$0xf] %vm154_vm0, %v284_v3  ;;  %s401_s10 = scalar_lea.vmem %s623_s18, 256  ;;  %s502_s20 = smov [#allocation5]  }
  0x37   : > { %p402_p8 = scmp.ne.s32.totalorder %s623_s18, %s401_s10  ;;  %s405_s30 = sshll.u32 %s502_s20, 4  ;;  %s406_s30 = int_to_ptr.vmem [resolvable:$false] %s405_s30 }
  0x38   : > { %s407_s26 = scalar_lea.vmem %s406_s30, 512  ;;  %p408_p4 = scmp.lt.s32.totalorder %s623_s18, %s406_s30 }
  0x39   : > { %p403_p0 = pnand %p402_p8, %p580_p9  ;;  %p409_p5 = scmp.lt.s32.totalorder %s407_s26, %s401_s10 }
  0x3b   : > { %p404_p2 = pneg %p403_p0  ;;  %p410_p3 = por %p409_p5, %p408_p4 }
  0x3d   : > { %p411_p6 = pnand %p410_p3, %p404_p2 }
  0x3f   : > { %414 = shalt.err (!%p411_p6)
}
  0x40   : > { %s415_s4 = scalar_lea.hbm %s628_s29, 256  ;;  %s419_s3 = scalar_lea.hbm %s682_s1, 2048 }
  0x41   : > { %p416_p7 = scmp.ne.s32.totalorder %s628_s29, %s415_s4  ;;  %p420_p13 = scmp.lt.s32.totalorder %s628_s29, %s682_s1 }
  0x42   : > { %p421_p1 = scmp.lt.s32.totalorder %s419_s3, %s415_s4 }
  0x43   : > { %p417_p10 = pnand %p416_p7, %p580_p9 }
  0x44   : > { %p422_p8 = por %p421_p1, %p420_p13 }
  0x45   : > { %p418_p11 = pneg %p417_p10 }
  0x47   : > { %p423_p0 = pnand %p422_p8, %p418_p11 }
  0x49   : > { %426 = shalt.err (!%p423_p0)
}
  0x4a   : > { %s503_s23 = smov 128   ;;  %s504_s24 = smov 8  }
  0x4b   : > { %293 = dma.vmem_to_hbm [thread:$0]  (%p580_p9), %s623_s18, 256, %s628_s29, %s166_s9, %s503_s23, %s503_s23, %s504_s24  }
  0x4c PF: > { %p304_p2 = scmp.ge.s32.totalorder %s497_s13, 2  ;;  %s196_s28 = sand.u32 1, %s469_s6  }
  0x4d   : > { %s197_s21 = scalar_lea.sflag [#allocation4], %s196_s28 }
  0x4e   : > { %p300_p4 = pnand %p304_p2, %p586_p12 }
  0x50   : > { %p301_p5 = pneg %p300_p4 }
  0x52   : > { %464 = dma.done.wait (%p301_p5), %s197_s21, 256  }
  0x53   : > { %466 = vsyncadd (%p301_p5), %s197_s21, 4294967040  ;;  %s17_s13 = sadd.s32 1, %s497_s13   ;;  %s688_s6 = smov %s473_s7 }
  0x54   : > { %p14_p3 = scmp.ge.s32.totalorder %s17_s13, 10   ;;  %s689_s7 = smov %s477_s8 }
  0x55   : > { %s690_s8 = smov %s593_s27  ;;  %s691_s9 = smov %s489_s11 }
  0x56   : > { %s692_s10 = smov %s493_s12  ;;  %s693_s11 = smov %s696_s16 }
  0x57   : > { %s694_s12 = smov %s700_s17  ;;  %16 = sbr.rel (!%p14_p3) target bundleno = 7 (0x7), region = 72 }
  0x5c   :  { %202 = vsyncpa [#allocation3], 1 }
  0x5d   :  { %204 = vsyncpa [#allocation3 + $0x1], 1 }
  0x5e   :  { %205 = vsyncpa [#allocation4], 1 }
  0x5f   :  { %207 = vsyncpa [#allocation4 + $0x1], 1 }

</bundles_post_ra>
